<compile_context>
chip_gen: v7x
topology: tpu7x:2x2x1
jax: 0.10.0
libtpu: 0.0.40
codegen_flags: <defaults>
</compile_context>

<pallas_src>
import math

import numpy as np
import jax
import jax.numpy as jnp
from jax.experimental import pallas as pl
from jax.experimental.pallas import tpu as pltpu


# ----------------------------- small helpers --------------------------------

def _compiler_params(semantics):
    # 'parallel' lets independent axes shard across v7x's 2 TensorCores;
    # 48 MiB stays under v7x's 64 MiB physical VMEM while lifting the
    # 16/32 MiB scoped defaults on v5e/v6e.
    return pltpu.CompilerParams(
        dimension_semantics=tuple(semantics),
        vmem_limit_bytes=48 * 1024 * 1024,
    )


def _row_tile(rows, cols, target_bytes=6 * 1024 * 1024):
    """Row tile for a lane-dense (rows, cols) f32 view.  ~6 MiB per block:
    per-grid-step overhead (~0.35us) becomes negligible vs the block DMA even
    at v7x's ~3.2 TB/s, and 3 arrays x 2 buffers x 6 MiB = 36 MiB < 48 MiB."""
    tr = max(1, target_bytes // max(1, cols * 4))
    if tr >= rows:
        return rows, 1
    tr = max(8, (tr // 8) * 8)
    if tr >= rows:
        return rows, 1
    return tr, pl.cdiv(rows, tr)


def _banded_matrix(n, sigma, dtype=jnp.float32):
    """(n, n) symmetric banded matrix implementing a zero-padded 'same' 1-D
    Gaussian convolution as a matmul (symmetric => left- or right-mult)."""
    sigma = max(float(sigma), 1e-3)
    tail = max(1, int(4.0 * sigma + 0.5))          # MONAI GaussianFilter truncated=4.0
    offs = np.arange(-tail, tail + 1, dtype=np.float32)
    w = np.exp(-0.5 * (offs / sigma) ** 2)
    w = w / w.sum()
    m = np.zeros((n, n), dtype=np.float32)
    for k in range(-tail, tail + 1):
        if abs(k) < n:
            m += w[k + tail] * np.eye(n, k=k, dtype=np.float32)
    return jnp.asarray(m, dtype)


_SMEM_SPEC = pl.BlockSpec(memory_space=pltpu.MemorySpace.SMEM)


# ------------------------------ Pallas kernels -------------------------------

def _noise_rng_kernel(x_ref, seed_ref, std_ref, o_ref):
    # Noise is generated on-chip: no HBM round-trip for the noise array.
    pltpu.prng_seed(seed_ref[0] + pl.program_id(0))
    n = pltpu.stateful_normal(x_ref.shape, jnp.float32)
    o_ref[...] = x_ref[...] + std_ref[0] * n


def _noise_add_kernel(x_ref, n_ref, std_ref, o_ref):
    # Fallback: external unit-normal array, std folded in-kernel (SMEM scalar).
    o_ref[...] = x_ref[...] + std_ref[0] * n_ref[...]


def _minmax_kernel(x_ref, mn_ref, mx_ref):
    # Single-pass fused global min/max; (1,1) VMEM accumulators revisited
    # across the 'arbitrary' grid axis.
    x = x_ref[...]
    bmn = jnp.min(jnp.min(x, axis=1, keepdims=True), axis=0, keepdims=True)
    bmx = jnp.max(jnp.max(x, axis=1, keepdims=True), axis=0, keepdims=True)

    @pl.when(pl.program_id(0) == 0)
    def _():
        mn_ref[...] = bmn
        mx_ref[...] = bmx

    @pl.when(pl.program_id(0) != 0)
    def _():
        mn_ref[...] = jnp.minimum(mn_ref[...], bmn)
        mx_ref[...] = jnp.maximum(mx_ref[...], bmx)


def _contrast_kernel(x_ref, p_ref, o_ref):
    # p_ref (SMEM, (3,)): [global_min, global_range, gamma]
    mn = p_ref[0]
    rng = p_ref[1]
    gamma = p_ref[2]
    x = x_ref[...]
    norm = (x - mn) / (rng + 1e-7)
    # norm**gamma via exp/log (EUP), exact 0 at norm == 0 (matches pow(0, g)).
    powed = jnp.where(norm <= 0.0, 0.0,
                      jnp.exp(gamma * jnp.log(jnp.maximum(norm, 1e-30))))
    o_ref[...] = powed * rng + mn


def _blur3d(x, md, mh, mw):
    """Separable zero-padded Gaussian blur of a (D, H, W) block via three 2-D
    banded-matrix matmuls on the MXU.  No (D,H,H) broadcasts; W pass is a
    layout-free merge, H pass uses a last-two-dims transpose + one stationary
    big matmul, only the D pass needs a (D, H*W) relayout."""
    d, h, w = x.shape
    cd = md.dtype
    # W axis (lane dim): layout-free (d*h, w) merge; band matrix on the right
    # (symmetric => right-mult == 'same' conv).
    x = jnp.dot(x.reshape(d * h, w).astype(cd), mw,
                preferred_element_type=jnp.float32).reshape(d, h, w)
    # H axis: minor-dims transpose (XLU), one big (d*w, h) @ (h, h) matmul so
    # the band matrix stays stationary in the MXU, transpose back.
    z = jnp.transpose(x, (0, 2, 1)).reshape(d * w, h).astype(cd)
    z = jnp.dot(z, mh, preferred_element_type=jnp.float32)
    x = jnp.transpose(z.reshape(d, w, h), (0, 2, 1))
    # D axis: single relayout to (d, h*w); band matrix on the left.
    x = jnp.dot(md, x.reshape(d, h * w).astype(cd),
                preferred_element_type=jnp.float32).reshape(d, h, w)
    return x


def _sharpen_kernel(img_ref, md1_ref, mh1_ref, mw1_ref,
                    md2_ref, mh2_ref, mw2_ref, alpha_ref, o_ref):
    # One channel per grid step; blur1, blur2 and the unsharp combine all stay
    # resident in VMEM (no HBM round-trips for intermediates).
    x = img_ref[0]
    b1 = _blur3d(x, md1_ref[...], mh1_ref[...], mw1_ref[...])
    b2 = _blur3d(b1, md2_ref[...], mh2_ref[...], mw2_ref[...])
    alpha = alpha_ref[0]
    # MONAI GaussianSharpen: blur1 + alpha * (blur1 - blur2(blur1))
    o_ref[0] = b1 + alpha * (b1 - b2)


# ------------------------------ pallas_call wrappers -------------------------

_FUSED_RNG = [hasattr(pltpu, "prng_seed") and hasattr(pltpu, "stateful_normal")]


def pallas_gaussian_noise(img, std, seed):
    """img + N(0, std^2) noise on a lane-dense (C*D, H*W) view, row-tiled,
    aliased in place.  RNG fused in-kernel when the stateful sampler exists."""
    C, D, H, W = img.shape
    rows, cols = C * D, H * W
    x2 = img.reshape(rows, cols)
    tr, nblk = _row_tile(rows, cols)
    spec = pl.BlockSpec((tr, cols), lambda i: (i, 0))
    std_arr = jnp.asarray([std], jnp.float32)

    if _FUSED_RNG[0]:
        try:
            seed_arr = jnp.asarray([seed], jnp.int32)
            out = pl.pallas_call(
                _noise_rng_kernel,
                out_shape=jax.ShapeDtypeStruct((rows, cols), jnp.float32),
                grid=(nblk,),
                in_specs=[spec, _SMEM_SPEC, _SMEM_SPEC],
                out_specs=spec,
                input_output_aliases={0: 0},
                compiler_params=_compiler_params(("parallel",)),
            )(x2, seed_arr, std_arr)
            return out.reshape(C, D, H, W)
        except Exception:
            _FUSED_RNG[0] = False  # TODO(synk): in-kernel RNG unsupported here; fall back.

    # Fallback: XLA normal draw; std-scale + add still fused in one pass.
    noise = jax.random.normal(jax.random.PRNGKey(seed), (rows, cols), jnp.float32)
    out = pl.pallas_call(
        _noise_add_kernel,
        out_shape=jax.ShapeDtypeStruct((rows, cols), jnp.float32),
        grid=(nblk,),
        in_specs=[spec, spec, _SMEM_SPEC],
        out_specs=spec,
        input_output_aliases={0: 0},
        compiler_params=_compiler_params(("parallel",)),
    )(x2, noise, std_arr)
    return out.reshape(C, D, H, W)


def pallas_min_max(img):
    """Global (min, max) in a single fused pass over the volume."""
    C, D, H, W = img.shape
    rows, cols = C * D, H * W
    x2 = img.reshape(rows, cols)
    tr, nblk = _row_tile(rows, cols)
    spec = pl.BlockSpec((tr, cols), lambda i: (i, 0))
    scalar_spec = pl.BlockSpec((1, 1), lambda i: (0, 0))
    mn, mx = pl.pallas_call(
        _minmax_kernel,
        out_shape=(jax.ShapeDtypeStruct((1, 1), jnp.float32),
                   jax.ShapeDtypeStruct((1, 1), jnp.float32)),
        grid=(nblk,),
        in_specs=[spec],
        out_specs=(scalar_spec, scalar_spec),
        compiler_params=_compiler_params(("arbitrary",)),
    )(x2)
    return mn[0, 0], mx[0, 0]


def pallas_adjust_contrast(img, gamma):
    """MONAI AdjustContrast gamma curve.  Global min/max come from ONE fused
    reduction pass; the elementwise curve is a second (tiled, in-place) pass
    with params in SMEM."""
    C, D, H, W = img.shape
    mn, mx = pallas_min_max(img)
    rows, cols = C * D, H * W
    x2 = img.reshape(rows, cols)
    params = jnp.stack([mn, mx - mn, jnp.float32(gamma)]).astype(jnp.float32)
    tr, nblk = _row_tile(rows, cols)
    spec = pl.BlockSpec((tr, cols), lambda i: (i, 0))
    out = pl.pallas_call(
        _contrast_kernel,
        out_shape=jax.ShapeDtypeStruct((rows, cols), jnp.float32),
        grid=(nblk,),
        in_specs=[spec, _SMEM_SPEC],
        out_specs=spec,
        input_output_aliases={0: 0},
        compiler_params=_compiler_params(("parallel",)),
    )(x2, params)
    return out.reshape(C, D, H, W)


def pallas_gaussian_sharpen(img, sigma1, sigma2, alpha, compute_dtype=jnp.bfloat16):
    """Fused MONAI GaussianSharpen: per-channel grid; the 6 separable Gaussian
    passes are banded-matrix MXU matmuls (bf16 operands by default, f32
    accumulation) with everything resident in VMEM."""
    C, D, H, W = img.shape
    md1 = _banded_matrix(D, sigma1[0], compute_dtype)
    mh1 = _banded_matrix(H, sigma1[1], compute_dtype)
    mw1 = _banded_matrix(W, sigma1[2], compute_dtype)
    md2 = _banded_matrix(D, sigma2[0], compute_dtype)
    mh2 = _banded_matrix(H, sigma2[1], compute_dtype)
    mw2 = _banded_matrix(W, sigma2[2], compute_dtype)
    alpha_arr = jnp.asarray([alpha], jnp.float32)

    vol_spec = pl.BlockSpec((1, D, H, W), lambda c: (c, 0, 0, 0))

    def mat_spec(n):
        return pl.BlockSpec((n, n), lambda c: (0, 0))

    # TODO(synk): for very large volumes (>=192^3) this per-channel block should
    # additionally be D-tiled with a +/-(tail1+tail2) halo to stay inside v7x's
    # 64 MiB VMEM; per-channel slabs are sufficient for typical sizes.
    return pl.pallas_call(
        _sharpen_kernel,
        out_shape=jax.ShapeDtypeStruct(img.shape, jnp.float32),
        grid=(C,),
        in_specs=[vol_spec,
                  mat_spec(D), mat_spec(H), mat_spec(W),
                  mat_spec(D), mat_spec(H), mat_spec(W),
                  _SMEM_SPEC],
        out_specs=vol_spec,
        input_output_aliases={0: 0},
        compiler_params=_compiler_params(("parallel",)),
    )(img, md1, mh1, mw1, md2, mh2, mw2, alpha_arr)


# ------------------------------ plain-JAX glue -------------------------------

def _zoom_keep_size(vol, z, method):
    """MONAI RandZoom(keep_size=True) with zoom factor z<=1: resize then
    center-pad back to the original spatial size (edge padding)."""
    # TODO(synk): trilinear / nearest resampling stays in plain JAX
    # (data-dependent interpolation gather has no clean Pallas mapping here).
    C, D, H, W = vol.shape
    nd = max(1, int(math.floor(D * z)))
    nh = max(1, int(math.floor(H * z)))
    nw = max(1, int(math.floor(W * z)))
    resized = jax.image.resize(vol, (C, nd, nh, nw), method=method)
    pads = [(0, 0)]
    for full, new in ((D, nd), (H, nh), (W, nw)):
        p = full - new
        pads.append((p // 2, p - p // 2))
    return jnp.pad(resized, pads, mode="edge")


class DataAugmenterPallas:
    """JAX/Pallas port of DataAugmenter_tmp.forward.

    Spatial transforms (zoom, flips) hit image AND label (label with nearest
    interpolation); intensity transforms (noise, sharpen, contrast) hit the
    image only.  Random decisions are host-side (like the PyTorch module), so
    disabled branches are skipped entirely instead of multiplied by 0.
    """

    def __init__(self, seed=0):
        self.rng = np.random.RandomState(seed)

    def __call__(self, images, labels):
        out_imgs, out_labs = [], []
        r = self.rng
        for b in range(images.shape[0]):
            img = jnp.asarray(images[b], jnp.float32)
            lab = jnp.asarray(labels[b], jnp.float32)

            # RandZoom(min_zoom=0.7, max_zoom=1.0, prob=0.15, ('trilinear','nearest'))
            if r.rand() < 0.15:
                z = float(r.uniform(0.7, 1.0))
                img = _zoom_keep_size(img, z, "linear")
                lab = _zoom_keep_size(lab, z, "nearest")

            # RandFlip(spatial_axis=1/2/3, prob=0.5 each)
            # TODO(synk): axis flips kept in plain JAX (pure data movement).
            for ax in (1, 2, 3):
                if r.rand() < 0.5:
                    img = jnp.flip(img, axis=ax)
                    lab = jnp.flip(lab, axis=ax)

            # RandGaussianNoise(prob=0.15, mean=0, std=0.33): actual std ~ U(0, 0.33)
            if r.rand() < 0.15:
                std = float(r.uniform(0.0, 0.33))
                seed = int(r.randint(0, 2 ** 31 - 1))
                img = pallas_gaussian_noise(img, std, seed)

            # RandGaussianSharpen(sigma1_x=(0.5,1.5), sigma2_x=(0.5,1.5), prob=0.15)
            if r.rand() < 0.15:
                s1 = (float(r.uniform(0.5, 1.5)),
                      float(r.uniform(0.5, 1.0)),
                      float(r.uniform(0.5, 1.0)))
                s2 = (float(r.uniform(0.5, 1.5)),
                      float(r.uniform(0.5, s1[1])),
                      float(r.uniform(0.5, s1[2])))
                alpha = float(r.uniform(10.0, 30.0))
                img = pallas_gaussian_sharpen(img, s1, s2, alpha)

            # RandAdjustContrast(gamma=(0.65, 1.5), prob=0.15)
            if r.rand() < 0.15:
                gamma = float(r.uniform(0.65, 1.5))
                img = pallas_adjust_contrast(img, gamma)

            out_imgs.append(img)
            out_labs.append(lab)
        return jnp.stack(out_imgs), jnp.stack(out_labs)


# ------------------------- pure-JAX references (tests) -----------------------

def _sharpen_ref(x, s1, s2, alpha):
    C, D, H, W = x.shape

    def blur(v, sig):
        md = _banded_matrix(D, sig[0])
        mh = _banded_matrix(H, sig[1])
        mw = _banded_matrix(W, sig[2])
        v = jnp.einsum("ed,cdhw->cehw", md, v)
        v = jnp.einsum("gh,cdhw->cdgw", mh, v)
        v = jnp.einsum("vw,cdhw->cdhv", mw, v)
        return v

    b1 = blur(x, s1)
    b2 = blur(b1, s2)
    return b1 + alpha * (b1 - b2)


def _contrast_ref(x, gamma):
    mn = jnp.min(x)
    rng = jnp.max(x) - mn
    return ((x - mn) / (rng + 1e-7)) ** gamma * rng + mn


# ------------------------------ demo -----------------------------------------

if __name__ == "__main__":
    key = jax.random.PRNGKey(0)
    k_img, k_lab = jax.random.split(key)
    B, C, D, H, W = 2, 2, 8, 8, 16
    images = jax.random.normal(k_img, (B, C, D, H, W), jnp.float32)
    labels = (jax.random.uniform(k_lab, (B, C, D, H, W)) > 0.5).astype(jnp.float32)

    # ---- direct smoke tests so every Pallas kernel is exercised ----
    vol = images[0]

    # Noise (statistical check: noise may be generated in-kernel).
    noised = pallas_gaussian_noise(vol, 0.25, seed=1234)
    diff = noised - vol
    assert noised.shape == vol.shape
    assert bool(jnp.all(jnp.isfinite(noised)))
    assert abs(float(jnp.mean(diff))) < 0.1
    assert 0.12 < float(jnp.std(diff)) < 0.4

    # Sharpen (reference computed BEFORE the Pallas calls: input is aliased).
    s1, s2, alpha = (1.0, 0.8, 0.7), (1.2, 0.6, 0.6), 2.0
    ref_sharp = _sharpen_ref(noised, s1, s2, alpha)
    sharp_f32 = pallas_gaussian_sharpen(noised * 1.0, s1, s2, alpha,
                                        compute_dtype=jnp.float32)
    # loose bound: MXU vs XLA matmul rounding, amplified by the unsharp alpha
    assert float(jnp.max(jnp.abs(sharp_f32 - ref_sharp))) < 0.3
    sharp_bf16 = pallas_gaussian_sharpen(noised * 1.0, s1, s2, alpha)  # bf16 MXU path
    assert float(jnp.max(jnp.abs(sharp_bf16 - ref_sharp))) < 0.6

    # Fused min/max + contrast.
    gamma = 1.2
    ref_con = _contrast_ref(sharp_f32, gamma)
    mn, mx = pallas_min_max(sharp_f32)
    assert abs(float(mn) - float(jnp.min(sharp_f32))) < 1e-6
    assert abs(float(mx) - float(jnp.max(sharp_f32))) < 1e-6
    contrasted = pallas_adjust_contrast(sharp_f32, gamma)
    assert bool(jnp.allclose(contrasted, ref_con, atol=5e-3, rtol=5e-3))
    jax.block_until_ready((noised, sharp_f32, sharp_bf16, contrasted))

    # ---- full augmentation pipeline (flag-gated, like the PyTorch module) ----
    aug = DataAugmenterPallas(seed=0)
    out_images, out_labels = aug(images, labels)
    out_images, out_labels = jax.block_until_ready((out_images, out_labels))

    assert out_images.shape == images.shape
    assert out_labels.shape == labels.shape
    assert bool(jnp.all(jnp.isfinite(out_images)))
    assert bool(jnp.all(jnp.isfinite(out_labels)))
    print("KERNEL_OK")
</pallas_src>

<mosaic_0001>
module attributes {stable_mosaic.version = 11 : i64} {
  func.func @_noise_rng_kernel(%arg0: i32, %arg1: memref<16x128xf32, #tpu.memory_space<vmem>>, %arg2: memref<1xi32, #tpu.memory_space<smem>>, %arg3: memref<1xf32, #tpu.memory_space<smem>>, %arg4: memref<16x128xf32, #tpu.memory_space<vmem>>) attributes {dimension_semantics = [#tpu.dimension_semantics<parallel>], iteration_bounds = array<i64: 1>, scalar_prefetch = 0 : i64, scratch_operands = 0 : i64, tpu.core_type = #tpu.core_type<tc>, window_params = [{transform_indices = @transform_0, window_bounds = array<i64: 16, 128>}, {transform_indices = @transform_1, window_bounds = array<i64: 1>}, {transform_indices = @transform_2, window_bounds = array<i64: 1>}, {transform_indices = @transform_3, window_bounds = array<i64: 16, 128>}]} {
    %c0 = arith.constant 0 : index
    %0 = memref.load %arg2[%c0] : memref<1xi32, #tpu.memory_space<smem>>
    %1 = arith.addi %0, %arg0 : i32
    "tpu.prng_set_seed_32"(%1) : (i32) -> ()
    %c0_i32 = arith.constant 0 : i32
    %c0_i32_0 = arith.constant 0 : i32
    %cst = arith.constant -0.99999994 : f32
    %cst_1 = arith.constant 1.000000e+00 : f32
    %2 = vector.broadcast %cst : f32 to vector<1x1xf32>
    %3 = vector.broadcast %cst_1 : f32 to vector<1x1xf32>
    %4 = "tpu.prng_random_bits"() : () -> vector<16x128xi32>
    %c9_i32 = arith.constant 9 : i32
    %5 = vector.broadcast %c9_i32 : i32 to vector<16x128xi32>
    %6 = arith.shrui %4, %5 : vector<16x128xi32>
    %c1065353216_i32 = arith.constant 1065353216 : i32
    %7 = vector.broadcast %c1065353216_i32 : i32 to vector<16x128xi32>
    %8 = arith.ori %6, %7 : vector<16x128xi32>
    %9 = tpu.bitcast %8 : vector<16x128xi32> -> vector<16x128xf32>
    %cst_2 = arith.constant 1.000000e+00 : f32
    %10 = vector.broadcast %cst_2 : f32 to vector<16x128xf32>
    %11 = arith.subf %9, %10 : vector<16x128xf32>
    %12 = arith.subf %3, %2 : vector<1x1xf32>
    %13 = vector.broadcast %12 : vector<1x1xf32> to vector<16x128xf32>
    %14 = arith.mulf %11, %13 : vector<16x128xf32>
    %15 = vector.broadcast %2 : vector<1x1xf32> to vector<16x128xf32>
    %16 = arith.addf %14, %15 : vector<16x128xf32>
    %17 = vector.broadcast %2 : vector<1x1xf32> to vector<16x128xf32>
    %18 = arith.maximumf %17, %16 : vector<16x128xf32>
    %cst_3 = arith.constant 0.000000e+00 : f32
    %19 = vector.broadcast %cst_3 : f32 to vector<16x128xf32>
    %20 = arith.subf %19, %18 : vector<16x128xf32>
    %21 = arith.mulf %18, %20 : vector<16x128xf32>
    %22 = math.log1p %21 : vector<16x128xf32>
    %cst_4 = arith.constant 0.000000e+00 : f32
    %23 = vector.broadcast %cst_4 : f32 to vector<16x128xf32>
    %24 = arith.subf %23, %22 : vector<16x128xf32>
    %cst_5 = arith.constant 5.000000e+00 : f32
    %25 = vector.broadcast %cst_5 : f32 to vector<16x128xf32>
    %26 = arith.cmpf olt, %24, %25 : vector<16x128xf32>
    %cst_6 = arith.constant 2.500000e+00 : f32
    %27 = vector.broadcast %cst_6 : f32 to vector<16x128xf32>
    %28 = arith.subf %24, %27 : vector<16x128xf32>
    %29 = math.sqrt %24 : vector<16x128xf32>
    %cst_7 = arith.constant 3.000000e+00 : f32
    %30 = vector.broadcast %cst_7 : f32 to vector<16x128xf32>
    %31 = arith.subf %29, %30 : vector<16x128xf32>
    %32 = arith.select %26, %28, %31 : vector<16x128xi1>, vector<16x128xf32>
    %cst_8 = arith.constant 2.81022636E-8 : f32
    %cst_9 = arith.constant -2.00214257E-4 : f32
    %33 = vector.broadcast %cst_8 : f32 to vector<16x128xf32>
    %34 = vector.broadcast %cst_9 : f32 to vector<16x128xf32>
    %35 = arith.select %26, %33, %34 : vector<16x128xi1>, vector<16x128xf32>
    %cst_10 = arith.constant 3.43273939E-7 : f32
    %cst_11 = arith.constant 1.00950558E-4 : f32
    %36 = vector.broadcast %cst_10 : f32 to vector<16x128xf32>
    %37 = vector.broadcast %cst_11 : f32 to vector<16x128xf32>
    %38 = arith.select %26, %36, %37 : vector<16x128xi1>, vector<16x128xf32>
    %39 = arith.mulf %35, %32 : vector<16x128xf32>
    %40 = arith.addf %38, %39 : vector<16x128xf32>
    %cst_12 = arith.constant -3.5233877E-6 : f32
    %cst_13 = arith.constant 0.00134934322 : f32
    %41 = vector.broadcast %cst_12 : f32 to vector<16x128xf32>
    %42 = vector.broadcast %cst_13 : f32 to vector<16x128xf32>
    %43 = arith.select %26, %41, %42 : vector<16x128xi1>, vector<16x128xf32>
    %44 = arith.mulf %40, %32 : vector<16x128xf32>
    %45 = arith.addf %43, %44 : vector<16x128xf32>
    %cst_14 = arith.constant -4.39150654E-6 : f32
    %cst_15 = arith.constant -0.00367342844 : f32
    %46 = vector.broadcast %cst_14 : f32 to vector<16x128xf32>
    %47 = vector.broadcast %cst_15 : f32 to vector<16x128xf32>
    %48 = arith.select %26, %46, %47 : vector<16x128xi1>, vector<16x128xf32>
    %49 = arith.mulf %45, %32 : vector<16x128xf32>
    %50 = arith.addf %48, %49 : vector<16x128xf32>
    %cst_16 = arith.constant 2.1858087E-4 : f32
    %cst_17 = arith.constant 0.00573950773 : f32
    %51 = vector.broadcast %cst_16 : f32 to vector<16x128xf32>
    %52 = vector.broadcast %cst_17 : f32 to vector<16x128xf32>
    %53 = arith.select %26, %51, %52 : vector<16x128xi1>, vector<16x128xf32>
    %54 = arith.mulf %50, %32 : vector<16x128xf32>
    %55 = arith.addf %53, %54 : vector<16x128xf32>
    %cst_18 = arith.constant -0.00125372503 : f32
    %cst_19 = arith.constant -0.0076224613 : f32
    %56 = vector.broadcast %cst_18 : f32 to vector<16x128xf32>
    %57 = vector.broadcast %cst_19 : f32 to vector<16x128xf32>
    %58 = arith.select %26, %56, %57 : vector<16x128xi1>, vector<16x128xf32>
    %59 = arith.mulf %55, %32 : vector<16x128xf32>
    %60 = arith.addf %58, %59 : vector<16x128xf32>
    %cst_20 = arith.constant -0.00417768164 : f32
    %cst_21 = arith.constant 0.00943887047 : f32
    %61 = vector.broadcast %cst_20 : f32 to vector<16x128xf32>
    %62 = vector.broadcast %cst_21 : f32 to vector<16x128xf32>
    %63 = arith.select %26, %61, %62 : vector<16x128xi1>, vector<16x128xf32>
    %64 = arith.mulf %60, %32 : vector<16x128xf32>
    %65 = arith.addf %63, %64 : vector<16x128xf32>
    %cst_22 = arith.constant 0.246640727 : f32
    %cst_23 = arith.constant 1.00167406 : f32
    %66 = vector.broadcast %cst_22 : f32 to vector<16x128xf32>
    %67 = vector.broadcast %cst_23 : f32 to vector<16x128xf32>
    %68 = arith.select %26, %66, %67 : vector<16x128xi1>, vector<16x128xf32>
    %69 = arith.mulf %65, %32 : vector<16x128xf32>
    %70 = arith.addf %68, %69 : vector<16x128xf32>
    %cst_24 = arith.constant 1.50140941 : f32
    %cst_25 = arith.constant 2.83297682 : f32
    %71 = vector.broadcast %cst_24 : f32 to vector<16x128xf32>
    %72 = vector.broadcast %cst_25 : f32 to vector<16x128xf32>
    %73 = arith.select %26, %71, %72 : vector<16x128xi1>, vector<16x128xf32>
    %74 = arith.mulf %70, %32 : vector<16x128xf32>
    %75 = arith.addf %73, %74 : vector<16x128xf32>
    %76 = math.absf %18 : vector<16x128xf32>
    %cst_26 = arith.constant 1.000000e+00 : f32
    %77 = vector.broadcast %cst_26 : f32 to vector<16x128xf32>
    %78 = arith.cmpf oeq, %76, %77 : vector<16x128xf32>
    %cst_27 = arith.constant 0x7F800000 : f32
    %79 = vector.broadcast %cst_27 : f32 to vector<16x128xf32>
    %80 = arith.mulf %79, %18 : vector<16x128xf32>
    %81 = arith.mulf %75, %18 : vector<16x128xf32>
    %82 = arith.select %78, %80, %81 : vector<16x128xi1>, vector<16x128xf32>
    %cst_28 = arith.constant 1.41421354 : f32
    %83 = vector.broadcast %cst_28 : f32 to vector<16x128xf32>
    %84 = arith.mulf %83, %82 : vector<16x128xf32>
    %c0_29 = arith.constant 0 : index
    %c0_30 = arith.constant 0 : index
    %85 = vector.load %arg1[%c0_29, %c0_30] : memref<16x128xf32, #tpu.memory_space<vmem>>, vector<16x128xf32>
    %c0_31 = arith.constant 0 : index
    %86 = memref.load %arg3[%c0_31] : memref<1xf32, #tpu.memory_space<smem>>
    %87 = vector.broadcast %86 : f32 to vector<16x128xf32>
    %88 = arith.mulf %87, %84 : vector<16x128xf32>
    %89 = arith.addf %85, %88 : vector<16x128xf32>
    %c0_32 = arith.constant 0 : index
    %c0_33 = arith.constant 0 : index
    %90 = vector.load %arg4[%c0_32, %c0_33] : memref<16x128xf32, #tpu.memory_space<vmem>>, vector<16x128xf32>
    tpu.vector_store %arg4[%c0_32, %c0_33], %89 {strides = array<i32>} : memref<16x128xf32, #tpu.memory_space<vmem>>, vector<16x128xf32>,
    return
  }
  func.func @transform_0(%arg0: i32) -> (i32, i32) {
    %c0_i32 = arith.constant 0 : i32
    %c0_i32_0 = arith.constant 0 : i32
    return %arg0, %c0_i32 : i32, i32
  }
  func.func @transform_1(%arg0: i32) -> i32 {
    %c0_i32 = arith.constant 0 : i32
    %c0_i32_0 = arith.constant 0 : i32
    return %c0_i32 : i32
  }
  func.func @transform_2(%arg0: i32) -> i32 {
    %c0_i32 = arith.constant 0 : i32
    %c0_i32_0 = arith.constant 0 : i32
    return %c0_i32 : i32
  }
  func.func @transform_3(%arg0: i32) -> (i32, i32) {
    %c0_i32 = arith.constant 0 : i32
    %c0_i32_0 = arith.constant 0 : i32
    return %arg0, %c0_i32 : i32, i32
  }
}

module attributes {stable_mosaic.version = 11 : i64} {
  func.func @_noise_add_kernel(%arg0: i32, %arg1: memref<16x128xf32, #tpu.memory_space<vmem>>, %arg2: memref<16x128xf32, #tpu.memory_space<vmem>>, %arg3: memref<1xf32, #tpu.memory_space<smem>>, %arg4: memref<16x128xf32, #tpu.memory_space<vmem>>) attributes {dimension_semantics = [#tpu.dimension_semantics<parallel>], iteration_bounds = array<i64: 1>, scalar_prefetch = 0 : i64, scratch_operands = 0 : i64, tpu.core_type = #tpu.core_type<tc>, window_params = [{transform_indices = @transform_0, window_bounds = array<i64: 16, 128>}, {transform_indices = @transform_1, window_bounds = array<i64: 16, 128>}, {transform_indices = @transform_2, window_bounds = array<i64: 1>}, {transform_indices = @transform_3, window_bounds = array<i64: 16, 128>}]} {
    %c0 = arith.constant 0 : index
    %c0_0 = arith.constant 0 : index
    %0 = vector.load %arg1[%c0, %c0_0] : memref<16x128xf32, #tpu.memory_space<vmem>>, vector<16x128xf32>
    %c0_1 = arith.constant 0 : index
    %1 = memref.load %arg3[%c0_1] : memref<1xf32, #tpu.memory_space<smem>>
    %c0_2 = arith.constant 0 : index
    %c0_3 = arith.constant 0 : index
    %2 = vector.load %arg2[%c0_2, %c0_3] : memref<16x128xf32, #tpu.memory_space<vmem>>, vector<16x128xf32>
    %3 = vector.broadcast %1 : f32 to vector<16x128xf32>
    %4 = arith.mulf %3, %2 : vector<16x128xf32>
    %5 = arith.addf %0, %4 : vector<16x128xf32>
    %c0_4 = arith.constant 0 : index
    %c0_5 = arith.constant 0 : index
    %6 = vector.load %arg4[%c0_4, %c0_5] : memref<16x128xf32, #tpu.memory_space<vmem>>, vector<16x128xf32>
    tpu.vector_store %arg4[%c0_4, %c0_5], %5 {strides = array<i32>} : memref<16x128xf32, #tpu.memory_space<vmem>>, vector<16x128xf32>,
    return
  }
  func.func @transform_0(%arg0: i32) -> (i32, i32) {
    %c0_i32 = arith.constant 0 : i32
    %c0_i32_0 = arith.constant 0 : i32
    return %arg0, %c0_i32 : i32, i32
  }
  func.func @transform_1(%arg0: i32) -> (i32, i32) {
    %c0_i32 = arith.constant 0 : i32
    %c0_i32_0 = arith.constant 0 : i32
    return %arg0, %c0_i32 : i32, i32
  }
  func.func @transform_2(%arg0: i32) -> i32 {
    %c0_i32 = arith.constant 0 : i32
    %c0_i32_0 = arith.constant 0 : i32
    return %c0_i32 : i32
  }
  func.func @transform_3(%arg0: i32) -> (i32, i32) {
    %c0_i32 = arith.constant 0 : i32
    %c0_i32_0 = arith.constant 0 : i32
    return %arg0, %c0_i32 : i32, i32
  }
}

</mosaic_0001>

<bundles_post_ra>
// kernel: tpu_custom_call.1
= control target key start
LH: loop header
LB: loop body
LE: loop exit
PB: predicated region body
PF: predicated region fallthrough
CT: control target
= control target key end

     0   :  { %10 = vsyncpa [#allocation5], 0  ;;  %s541_s0 = inlined_call_operand.hbm [shape: f32[16,128], index: 0, kind: input, shape index: {}, may-alias: {0,3}]   ;;  %s542_s1 = inlined_call_operand.<no memory space> [shape: s32[1], index: 1, kind: input, shape index: {}]   ;;  %s543_s2 = inlined_call_operand.<no memory space> [shape: f32[1], index: 2, kind: input, shape index: {}]   ;;  %s544_s3 = inlined_call_operand.hbm [shape: f32[16,128], index: 3, kind: output, shape index: {}, may-alias: {0,3}]  }
   0x1   :  { %11 = vsyncpa [#allocation6], 0  ;;  %s381_s12 = smov [#allocation4]   ;;  %s333_s16 = scalar_lea.hbm %s541_s0, 256 }
   0x2   :  { %s17_s13 = sshll.u32 %s381_s12, 4  ;;  %p334_p0 = scmp.ne.s32.totalorder %s541_s0, %s333_s16  ;;  %s18_s13 = int_to_ptr.vmem [resolvable:$true] %s17_s13 }
   0x3   :  { %p337_p1 = scmp.lt.u32.totalorder %s333_s16, %s541_s0 }
   0x5   :  { %p339_p2 = pnand %p337_p1, %p334_p0 }
   0x7   :  { %342 = shalt.err (!%p339_p2)
}
   0x8   :  { %s343_s21 = scalar_lea.vmem %s18_s13, 256  ;;  %p348_p4 = scmp.lt.s32.totalorder %s18_s13, %s18_s13 }
   0x9   :  { %p344_p3 = scmp.ne.s32.totalorder %s18_s13, %s343_s21  ;;  %p349_p5 = scmp.lt.s32.totalorder %s343_s21, %s343_s21 }
   0xb   :  { %p350_p6 = por %p349_p5, %p348_p4 }
   0xd   :  { %p351_p7 = pnand %p350_p6, %p344_p3 }
   0xf   :  { %354 = shalt.err (!%p351_p7)
}
  0x10   :  { %s382_s22 = smov 128   ;;  %s383_s23 = smov 8   ;;  %v33_v0 = vlaneseq  ;;  %v432_v1 = vstv %s542_s1 }
  0x11   :  { %23 = dma.hbm_to_vmem [thread:$0]  %s541_s0, 256, %s18_s13, [#allocation5], %s382_s22, %s382_s22, %s383_s23  }
  0x12   :  { %377 = dma.done.wait [#allocation5], 256  }
  0x13   :  { %378 = vsyncadd [#allocation5], 4294967040  ;;  %v37_v2 = vadd.s32 %v432_v1, %v33_v0  ;;  %v35_v17 = vxor.u32 %v432_v1, %v432_v1  ;;  %s393_s28 = smov [#allocation7]  }
  0x14   :  { %s294_s29 = sshll.u32 %s393_s28, 4  ;;  %s295_s29 = int_to_ptr.vmem [resolvable:$true] %s294_s29 }
  0x15   :  { %v38_v3 = vadd.s32 %v37_v2, %v37_v2  ;;  %v39_v4 = vshll.u32 %v37_v2, 13  ;;  %v40_v5 = vshrl.u32 %v37_v2, 19  ;;  %v437_v22 = vxor.u32 466688986, %v35_v17  ;;  %s355_s30 = scalar_lea.vmem %s295_s29, 256  ;;  %p360_p9 = scmp.lt.s32.totalorder %s295_s29, %s295_s29 }
  0x16   :  { %p356_p8 = scmp.ne.s32.totalorder %s295_s29, %s355_s30  ;;  %p361_p10 = scmp.lt.s32.totalorder %s355_s30, %s355_s30 }
  0x17   :  { %v41_v6 = vor.u32 %v40_v5, %v39_v4 }
  0x18   :  { %p362_p11 = por %p361_p10, %p360_p9 }
  0x19   :  { %v42_v7 = vxor.u32 %v41_v6, %v38_v3 }
  0x1a   :  { %p363_p12 = pnand %p362_p11, %p356_p8 }
  0x1b   :  { %v43_v8 = vadd.s32 %v42_v7, %v38_v3  ;;  %v44_v9 = vshll.u32 %v42_v7, 15  ;;  %v45_v10 = vshrl.u32 %v42_v7, 17 }
  0x1d   :  { %v46_v11 = vor.u32 %v45_v10, %v44_v9 }
  0x1f   :  { %v47_v12 = vxor.u32 %v46_v11, %v43_v8 }
  0x21   :  { %v48_v13 = vadd.s32 %v47_v12, %v43_v8  ;;  %v49_v14 = vshll.u32 %v47_v12, 26  ;;  %v50_v15 = vshrl.u32 %v47_v12, 6 }
  0x23   :  { %v51_v16 = vor.u32 %v50_v15, %v49_v14 }
  0x25   :  { %v52_v18 = vxor.u32 %v51_v16, %v48_v13 }
  0x27   :  { %v53_v19 = vadd.s32 %v52_v18, %v48_v13  ;;  %v54_v20 = vshll.u32 %v52_v18, 6  ;;  %v55_v21 = vshrl.u32 %v52_v18, 26 }
  0x29   :  { %v56_v23 = vor.u32 %v55_v21, %v54_v20  ;;  %v58_v25 = vadd.s32 %v53_v19, %v432_v1 }
  0x2b   :  { %v57_v24 = vxor.u32 %v56_v23, %v53_v19 }
  0x2d   :  { %v59_v26 = vadd.s32 %v57_v24, %v437_v22 }
  0x2f   :  { %v60_v27 = vadd.s32 1, %v59_v26 }
  0x31   :  { %v61_v28 = vadd.s32 %v60_v27, %v58_v25  ;;  %v62_v29 = vshll.u32 %v60_v27, 17  ;;  %v63_v30 = vshrl.u32 %v60_v27, 15 }
  0x33   :  { %v64_v31 = vor.u32 %v63_v30, %v62_v29 }
  0x35   :  { %v65_v32 = vxor.u32 %v64_v31, %v61_v28 }
  0x37   :  { %v66_v33 = vadd.s32 %v65_v32, %v61_v28  ;;  %v67_v34 = vshll.u32 %v65_v32, 29  ;;  %v68_v35 = vshrl.u32 %v65_v32, 3 }
  0x39   :  { %v69_v36 = vor.u32 %v68_v35, %v67_v34 }
  0x3b   :  { %v70_v37 = vxor.u32 %v69_v36, %v66_v33 }
  0x3d   :  { %v71_v38 = vadd.s32 %v70_v37, %v66_v33  ;;  %v72_v39 = vshll.u32 %v70_v37, 16  ;;  %v73_v40 = vshrl.u32 %v70_v37, 16 }
  0x3f   :  { %v74_v41 = vor.u32 %v73_v40, %v72_v39 }
  0x41   :  { %v75_v42 = vxor.u32 %v74_v41, %v71_v38 }
  0x43   :  { %v76_v43 = vadd.s32 %v75_v42, %v71_v38  ;;  %v77_v44 = vshll.u32 %v75_v42, 24  ;;  %v78_v45 = vshrl.u32 %v75_v42, 8 }
  0x45   :  { %v79_v46 = vor.u32 %v78_v45, %v77_v44  ;;  %v81_v48 = vadd.s32 %v76_v43, %v437_v22 }
  0x47   :  { %v80_v47 = vxor.u32 %v79_v46, %v76_v43 }
  0x49   :  { %v82_v49 = vadd.s32 %v80_v47, %v432_v1 }
  0x4b   :  { %v83_v50 = vadd.s32 2, %v82_v49 }
  0x4d   :  { %v84_v51 = vadd.s32 %v83_v50, %v81_v48  ;;  %v85_v52 = vshll.u32 %v83_v50, 13  ;;  %v86_v53 = vshrl.u32 %v83_v50, 19 }
  0x4f   :  { %v87_v54 = vor.u32 %v86_v53, %v85_v52 }
  0x51   :  { %v88_v55 = vxor.u32 %v87_v54, %v84_v51 }
  0x53   :  { %v89_v56 = vadd.s32 %v88_v55, %v84_v51  ;;  %v90_v57 = vshll.u32 %v88_v55, 15  ;;  %v91_v58 = vshrl.u32 %v88_v55, 17 }
  0x55   :  { %v92_v59 = vor.u32 %v91_v58, %v90_v57 }
  0x57   :  { %v93_v60 = vxor.u32 %v92_v59, %v89_v56 }
  0x59   :  { %v94_v61 = vadd.s32 %v93_v60, %v89_v56  ;;  %v95_v62 = vshll.u32 %v93_v60, 26  ;;  %v96_v63 = vshrl.u32 %v93_v60, 6 }
  0x5b   :  { %v97_v0 = vor.u32 %v96_v63, %v95_v62 }
  0x5d   :  { %v98_v2 = vxor.u32 %v97_v0, %v94_v61 }
  0x5f   :  { %v99_v3 = vadd.s32 %v98_v2, %v94_v61  ;;  %v100_v4 = vshll.u32 %v98_v2, 6  ;;  %v101_v5 = vshrl.u32 %v98_v2, 26 }
  0x61   :  { %v102_v6 = vor.u32 %v101_v5, %v100_v4  ;;  %v104_v8 = vadd.s32 %v99_v3, %v432_v1 }
  0x63   :  { %v103_v7 = vxor.u32 %v102_v6, %v99_v3 }
  0x65   :  { %v105_v9 = vadd.s32 %v103_v7, %v432_v1 }
  0x67   :  { %v106_v10 = vadd.s32 3, %v105_v9 }
  0x69   :  { %v107_v11 = vadd.s32 %v106_v10, %v104_v8  ;;  %v108_v12 = vshll.u32 %v106_v10, 17  ;;  %v109_v13 = vshrl.u32 %v106_v10, 15 }
  0x6b   :  { %v110_v14 = vor.u32 %v109_v13, %v108_v12 }
  0x6d   :  { %v111_v15 = vxor.u32 %v110_v14, %v107_v11 }
  0x6f   :  { %v112_v16 = vadd.s32 %v111_v15, %v107_v11  ;;  %v113_v17 = vshll.u32 %v111_v15, 29  ;;  %v114_v18 = vshrl.u32 %v111_v15, 3 }
  0x71   :  { %v115_v19 = vor.u32 %v114_v18, %v113_v17 }
  0x73   :  { %v116_v20 = vxor.u32 %v115_v19, %v112_v16 }
  0x75   :  { %v117_v21 = vadd.s32 %v116_v20, %v112_v16  ;;  %v118_v23 = vshll.u32 %v116_v20, 16  ;;  %v119_v24 = vshrl.u32 %v116_v20, 16 }
  0x77   :  { %v120_v25 = vor.u32 %v119_v24, %v118_v23 }
  0x79   :  { %v121_v26 = vxor.u32 %v120_v25, %v117_v21 }
  0x7b   :  { %v122_v27 = vadd.s32 %v121_v26, %v117_v21  ;;  %v123_v28 = vshll.u32 %v121_v26, 24  ;;  %v124_v29 = vshrl.u32 %v121_v26, 8 }
  0x7d   :  { %v125_v30 = vor.u32 %v124_v29, %v123_v28  ;;  %v127_v32 = vadd.s32 %v122_v27, %v432_v1 }
  0x7f   :  { %v126_v31 = vxor.u32 %v125_v30, %v122_v27 }
  0x81   :  { %v128_v33 = vadd.s32 %v126_v31, %v437_v22 }
  0x83   :  { %v129_v34 = vadd.s32 4, %v128_v33 }
  0x85   :  { %v130_v35 = vadd.s32 %v129_v34, %v127_v32  ;;  %v131_v36 = vshll.u32 %v129_v34, 13  ;;  %v132_v37 = vshrl.u32 %v129_v34, 19 }
  0x87   :  { %v133_v38 = vor.u32 %v132_v37, %v131_v36 }
  0x89   :  { %v134_v39 = vxor.u32 %v133_v38, %v130_v35 }
  0x8b   :  { %v135_v40 = vadd.s32 %v134_v39, %v130_v35  ;;  %v136_v41 = vshll.u32 %v134_v39, 15  ;;  %v137_v42 = vshrl.u32 %v134_v39, 17 }
  0x8d   :  { %v138_v43 = vor.u32 %v137_v42, %v136_v41 }
  0x8f   :  { %v139_v44 = vxor.u32 %v138_v43, %v135_v40 }
  0x91   :  { %v140_v45 = vadd.s32 %v139_v44, %v135_v40  ;;  %v141_v46 = vshll.u32 %v139_v44, 26  ;;  %v142_v47 = vshrl.u32 %v139_v44, 6 }
  0x93   :  { %v143_v48 = vor.u32 %v142_v47, %v141_v46  ;;  %v384_v46 = vmov -0.00020021426  }
  0x95   :  { %v144_v49 = vxor.u32 %v143_v48, %v140_v45 }
  0x97   :  { %v145_v50 = vadd.s32 %v144_v49, %v140_v45  ;;  %v146_v51 = vshll.u32 %v144_v49, 6  ;;  %v147_v52 = vshrl.u32 %v144_v49, 26 }
  0x99   :  { %v148_v53 = vor.u32 %v147_v52, %v146_v51  ;;  %v150_v55 = vadd.s32 %v145_v50, %v437_v22  ;;  %v385_v51 = vmov 0.00010095056  }
  0x9b   :  { %v149_v54 = vxor.u32 %v148_v53, %v145_v50 }
  0x9d   :  { %v151_v56 = vadd.s32 %v149_v54, %v432_v1 }
  0x9f   :  { %v152_v57 = vadd.s32 5, %v151_v56 }
  0xa1   :  { %v153_v58 = vxor.u32 %v152_v57, %v150_v55 }
  0xa3   :  { %154 = set.rngseed %v153_v58  ;;  %v386_v58 = vmov 0.0013493432  }
  0xa4   :  { %v155_v59 = vrng }
  0xa5   :  { %v157_v60 = vshrl.u32 %v155_v59, 9  ;;  %v156_v61 = vrng }
  0xa6   :  { %v158_v62 = vshrl.u32 %v156_v61, 9 }
  0xa7   :  { %v159_v63 = vor.u32 1065353216, %v157_v60 }
  0xa8   :  { %v160_v0 = vor.u32 1065353216, %v158_v62 }
  0xa9   :  { %v306_v2 = vadd.f32 -1.0, %v159_v63 }
  0xaa   :  { %v307_v3 = vadd.f32 -1.0, %v160_v0 }
  0xab   :  { %v165_v4 = vmul.f32 2.0, %v306_v2  ;;  %v387_v2 = vmov -0.0036734284  }
  0xac   :  { %v166_v5 = vmul.f32 2.0, %v307_v3 }
  0xad   :  { %v167_v6 = vadd.f32 -0.99999994, %v165_v4 }
  0xae   :  { %v168_v7 = vadd.f32 -0.99999994, %v166_v5 }
  0xaf   :  { %v449_v8 = vmax.f32 %v167_v6, -0.99999994 }
  0xb0   :  { %v451_v22 = vmax.f32 %v168_v7, -0.99999994 }
  0xb1   :  { %v171_v1 = vsub.f32 0.0, %v449_v8 }
  0xb2   :  { %v172_v9 = vsub.f32 0.0, %v451_v22 }
  0xb3   :  { %v173_v10 = vmul.f32 %v171_v1, %v449_v8 }
  0xb4   :  { %v174_v11 = vmul.f32 %v172_v9, %v451_v22  ;;  %v388_v9 = vmov 0.0057395077  }
  0xb5   :  { %v175_v12 = vadd.f32 1.0, %v173_v10  ;;  %v178_v14 = vmul.f32 -0.5, %v173_v10  ;;  %v181_v17 = vand.u32 2147483647, %v173_v10 }
  0xb6   :  { %v184_v13 = vadd.f32 1.0, %v174_v11  ;;  %v187_v15 = vmul.f32 -0.5, %v174_v11  ;;  %v190_v19 = vand.u32 2147483647, %v174_v11 }
  0xb7   :  { %325 = vlog2.f32 %v175_v12  ;;  %v179_v16 = vadd.f32 1.0, %v178_v14  ;;  %vm182_vm0 = vcmp.lt.f32.partialorder %v181_v17, 0.0004427343 }
  0xb8   :  { %327 = vlog2.f32 %v184_v13  ;;  %v188_v18 = vadd.f32 1.0, %v187_v15  ;;  %vm191_vm1 = vcmp.lt.f32.partialorder %v190_v19, 0.0004427343 }
  0xb9   :  { %v180_v24 = vmul.f32 %v179_v16, %v173_v10  ;;  %v389_v16 = vmov -0.0076224613  }
  0xba   :  { %v189_v26 = vmul.f32 %v188_v18, %v174_v11 }
  0xc1   :  { %v326_v20 = vpop.eup %325 }
  0xc2   :  { %v328_v21 = vpop.eup %327  ;;  %v177_v23 = vmul.f32 0.6931472, %v326_v20 }
  0xc3   :  { %v186_v25 = vmul.f32 0.6931472, %v328_v21 }
  0xc4   :  { %v183_v27 = vsel %vm182_vm0, %v180_v24, %v177_v23  ;;  %v390_v24 = vmov 0.0094388705  }
  0xc5   :  { %v457_v28 = vsub.f32 0.0, %v183_v27  ;;  %v192_v29 = vsel %vm191_vm1, %v189_v26, %v186_v25 }
  0xc6   :  { %v459_v30 = vsub.f32 0.0, %v192_v29 }
  0xc7   :  { %329 = vrsqrt.f32 %v457_v28  ;;  %vm201_vm2 = vcmp.eq.f32.partialorder %v457_v28, inf  ;;  %v204_v34 = vand.u32 2147483648, %v457_v28  ;;  %vm203_vm3 = vcmp.eq.f32.partialorder %v457_v28, 0.0 }
  0xc8   :  { %331 = vrsqrt.f32 %v459_v30  ;;  %vm195_vm4 = vcmp.lt.f32.partialorder %v457_v28, 5.0  ;;  %vm208_vm5 = vcmp.eq.f32.partialorder %v459_v30, inf  ;;  %v211_v38 = vand.u32 2147483648, %v459_v30 }
  0xc9   :  { %v308_v39 = vadd.f32 -2.5, %v457_v28  ;;  %vm210_vm6 = vcmp.eq.f32.partialorder %v459_v30, 0.0  ;;  %vm196_vm7 = vcmp.lt.f32.partialorder %v459_v30, 5.0  ;;  %v309_v43 = vadd.f32 -2.5, %v459_v30 }
  0xca   :  { %v217_v47 = vsel %vm195_vm4, 2.8102264e-08, %v384_v46  ;;  %v218_v50 = vsel %vm196_vm7, 2.8102264e-08, %v384_v46  ;;  %v219_v52 = vsel %vm195_vm4, 3.4327394e-07, %v385_v51 }
  0xcb   :  { %v220_v55 = vsel %vm196_vm7, 3.4327394e-07, %v385_v51  ;;  %v225_v59 = vsel %vm195_vm4, -3.5233877e-06, %v386_v58  ;;  %v226_v62 = vsel %vm196_vm7, -3.5233877e-06, %v386_v58 }
  0xcc   :  { %v231_v3 = vsel %vm195_vm4, -4.3915065e-06, %v387_v2  ;;  %v232_v6 = vsel %vm196_vm7, -4.3915065e-06, %v387_v2  ;;  %v237_v10 = vsel %vm195_vm4, 0.00021858087, %v388_v9 }
  0xcd   :  { %v238_v13 = vsel %vm196_vm7, 0.00021858087, %v388_v9  ;;  %v243_v17 = vsel %vm195_vm4, -0.001253725, %v389_v16  ;;  %v244_v20 = vsel %vm196_vm7, -0.001253725, %v389_v16 }
  0xce   :  { %v249_v25 = vsel %vm195_vm4, -0.0041776816, %v390_v24  ;;  %v250_v29 = vsel %vm196_vm7, -0.0041776816, %v390_v24 }
  0xd1   :  { %v330_v31 = vpop.eup %329 }
  0xd2   :  { %v200_v32 = vmul.f32 %v330_v31, %v457_v28  ;;  %v332_v33 = vpop.eup %331 }
  0xd3   :  { %v207_v36 = vmul.f32 %v332_v33, %v459_v30  ;;  %v391_v33 = vmov 1.001674  }
  0xd4   :  { %v202_v35 = vsel %vm201_vm2, %v457_v28, %v200_v32 }
  0xd5   :  { %v205_v37 = vsel %vm203_vm3, %v204_v34, %v202_v35  ;;  %v209_v40 = vsel %vm208_vm5, %v459_v30, %v207_v36  ;;  %v255_v34 = vsel %vm195_vm4, 0.24664073, %v391_v33 }
  0xd6   :  { %v310_v41 = vadd.f32 -3.0, %v205_v37  ;;  %v212_v42 = vsel %vm210_vm6, %v211_v38, %v209_v40  ;;  %v256_v37 = vsel %vm196_vm7, 0.24664073, %v391_v33  ;;  %v392_v40 = vmov 2.8329768  }
  0xd7   :  { %v311_v44 = vadd.f32 -3.0, %v212_v42  ;;  %v267_v42 = vand.u32 2147483647, %v449_v8  ;;  %v262_v46 = vsel %vm196_vm7, 1.5014094, %v392_v40 }
  0xd8   :  { %v215_v45 = vsel %vm195_vm4, %v308_v39, %v310_v41  ;;  %v261_v41 = vsel %vm195_vm4, 1.5014094, %v392_v40 }
  0xd9   :  { %v221_v48 = vmul.f32 %v217_v47, %v215_v45  ;;  %v216_v49 = vsel %vm196_vm7, %v309_v43, %v311_v44  ;;  %v268_v47 = vand.u32 2147483647, %v451_v22  ;;  %vm269_vm8 = vcmp.eq.f32.partialorder %v267_v42, 1.0 }
  0xda   :  { %v222_v53 = vmul.f32 %v218_v50, %v216_v49  ;;  %v271_v50 = vmul.f32 inf, %v449_v8 }
  0xdb   :  { %v223_v54 = vadd.f32 %v221_v48, %v219_v52  ;;  %vm270_vm9 = vcmp.eq.f32.partialorder %v268_v47, 1.0 }
  0xdc   :  { %v224_v56 = vadd.f32 %v222_v53, %v220_v55 }
  0xdd   :  { %v227_v57 = vmul.f32 %v223_v54, %v215_v45  ;;  %v279_v54 = vld [vmem:[#allocation4] sm:$0xff] }
  0xde   :  { %v228_v60 = vmul.f32 %v224_v56, %v216_v49 }
  0xdf   :  { %v229_v61 = vadd.f32 %v227_v57, %v225_v59  ;;  %v280_v57 = vld [vmem:[#allocation4 + $0x8] sm:$0xff] }
  0xe0   :  { %v230_v63 = vadd.f32 %v228_v60, %v226_v62 }
  0xe1   :  { %v233_v0 = vmul.f32 %v229_v61, %v215_v45 }
  0xe2   :  { %v234_v4 = vmul.f32 %v230_v63, %v216_v49 }
  0xe3   :  { %v235_v5 = vadd.f32 %v233_v0, %v231_v3 }
  0xe4   :  { %v236_v7 = vadd.f32 %v234_v4, %v232_v6 }
  0xe5   :  { %v239_v1 = vmul.f32 %v235_v5, %v215_v45 }
  0xe6   :  { %v240_v11 = vmul.f32 %v236_v7, %v216_v49 }
  0xe7   :  { %v241_v12 = vadd.f32 %v239_v1, %v237_v10 }
  0xe8   :  { %v242_v14 = vadd.f32 %v240_v11, %v238_v13 }
  0xe9   :  { %v245_v15 = vmul.f32 %v241_v12, %v215_v45 }
  0xea   :  { %v246_v18 = vmul.f32 %v242_v14, %v216_v49 }
  0xeb   :  { %v247_v19 = vadd.f32 %v245_v15, %v243_v17 }
  0xec   :  { %v248_v21 = vadd.f32 %v246_v18, %v244_v20 }
  0xed   :  { %v251_v23 = vmul.f32 %v247_v19, %v215_v45 }
  0xee   :  { %v252_v26 = vmul.f32 %v248_v21, %v216_v49 }
  0xef   :  { %v253_v27 = vadd.f32 %v251_v23, %v249_v25 }
  0xf0   :  { %v254_v31 = vadd.f32 %v252_v26, %v250_v29 }
  0xf1   :  { %v257_v32 = vmul.f32 %v253_v27, %v215_v45 }
  0xf2   :  { %v258_v35 = vmul.f32 %v254_v31, %v216_v49 }
  0xf3   :  { %v259_v36 = vadd.f32 %v257_v32, %v255_v34 }
  0xf4   :  { %v260_v38 = vadd.f32 %v258_v35, %v256_v37 }
  0xf5   :  { %v263_v39 = vmul.f32 %v259_v36, %v215_v45  ;;  %v272_v45 = vmul.f32 inf, %v451_v22 }
  0xf6   :  { %v264_v43 = vmul.f32 %v260_v38, %v216_v49  ;;  %v282_v49 = vstv %s543_s2 }
  0xf7   :  { %v265_v44 = vadd.f32 %v263_v39, %v261_v41 }
  0xf8   :  { %v266_v48 = vadd.f32 %v264_v43, %v262_v46 }
  0xf9   :  { %v273_v51 = vmul.f32 %v265_v44, %v449_v8 }
  0xfa   :  { %v274_v28 = vmul.f32 %v266_v48, %v451_v22 }
  0xfb   :  { %v275_v52 = vsel %vm269_vm8, %v271_v50, %v273_v51 }
  0xfc   :  { %v277_v30 = vmul.f32 1.4142135, %v275_v52  ;;  %v276_v53 = vsel %vm270_vm9, %v272_v45, %v274_v28 }
  0xfd   :  { %v278_v55 = vmul.f32 1.4142135, %v276_v53 }
  0xfe   :  { %v283_v56 = vmul.f32 %v282_v49, %v277_v30 }
  0xff   :  { %v284_v8 = vmul.f32 %v282_v49, %v278_v55 }
 0x100   :  { %v285_v58 = vadd.f32 %v283_v56, %v279_v54 }
 0x101   :  { %v286_v59 = vadd.f32 %v284_v8, %v280_v57 }
 0x102   :  { %287 = vst [vmem:[#allocation7] sm:$0xff] %v285_v58 }
 0x103   :  { %288 = vst [vmem:[#allocation7 + $0x8] sm:$0xff] %v286_v59 }
 0x104   :  { %366 = shalt.err (!%p363_p12)
}
 0x105   :  { %s367_s5 = scalar_lea.hbm %s544_s3, 256 }
 0x106   :  { %p368_p13 = scmp.ne.s32.totalorder %s544_s3, %s367_s5  ;;  %p371_p0 = scmp.lt.u32.totalorder %s367_s5, %s544_s3 }
 0x108   :  { %p373_p1 = pnand %p371_p0, %p368_p13 }
 0x10a   :  { %376 = shalt.err (!%p373_p1)
}
 0x10b   :  { %300 = dma.vmem_to_hbm [thread:$0]  %s295_s29, 256, %s544_s3, [#allocation6], %s382_s22, %s382_s22, %s383_s23  }
 0x10c   :  { %379 = dma.done.wait [#allocation6], 256  }
 0x10d   :  { %380 = vsyncadd [#allocation6], 4294967040 }
 0x10e   :  { %304 = vsyncpa [#allocation5], 1 }
 0x10f   :  { %305 = vsyncpa [#allocation6], 1 }

// kernel: tpu_custom_call.1
= control target key start
LH: loop header
LB: loop body
LE: loop exit
PB: predicated region body
PF: predicated region fallthrough
CT: control target
= control target key end

     0   :  { %9 = vsyncpa [#allocation4], 0  ;;  %s174_s0 = inlined_call_operand.hbm [shape: f32[16,128], index: 0, kind: input, shape index: {}, may-alias: {0,3}]   ;;  %s175_s1 = inlined_call_operand.vmem [shape: f32[16,128], index: 1, kind: input, shape index: {}]   ;;  %s176_s2 = inlined_call_operand.<no memory space> [shape: f32[1], index: 2, kind: input, shape index: {}]   ;;  %s177_s3 = inlined_call_operand.hbm [shape: f32[16,128], index: 3, kind: output, shape index: {}, may-alias: {0,3}]  }
   0x1   :  { %10 = vsyncpa [#allocation5], 0  ;;  %s111_s12 = smov [#allocation3]   ;;  %s63_s16 = scalar_lea.hbm %s174_s0, 256 }
   0x2   :  { %s16_s13 = sshll.u32 %s111_s12, 4  ;;  %p64_p0 = scmp.ne.s32.totalorder %s174_s0, %s63_s16  ;;  %s17_s13 = int_to_ptr.vmem [resolvable:$true] %s16_s13 }
   0x3   :  { %p67_p1 = scmp.lt.u32.totalorder %s63_s16, %s174_s0 }
   0x5   :  { %p69_p2 = pnand %p67_p1, %p64_p0 }
   0x7   :  { %72 = shalt.err (!%p69_p2)
}
   0x8   :  { %s73_s21 = scalar_lea.vmem %s17_s13, 256  ;;  %p78_p4 = scmp.lt.s32.totalorder %s17_s13, %s17_s13 }
   0x9   :  { %p74_p3 = scmp.ne.s32.totalorder %s17_s13, %s73_s21  ;;  %p79_p5 = scmp.lt.s32.totalorder %s73_s21, %s73_s21 }
   0xb   :  { %p80_p6 = por %p79_p5, %p78_p4 }
   0xd   :  { %p81_p7 = pnand %p80_p6, %p74_p3 }
   0xf   :  { %84 = shalt.err (!%p81_p7)
}
  0x10   :  { %s112_s22 = smov 128   ;;  %s113_s23 = smov 8  }
  0x11   :  { %22 = dma.hbm_to_vmem [thread:$0]  %s174_s0, 256, %s17_s13, [#allocation4], %s112_s22, %s112_s22, %s113_s23  }
  0x12   :  { %107 = dma.done.wait [#allocation4], 256  }
  0x13   :  { %108 = vsyncadd [#allocation4], 4294967040  ;;  %v35_v0 = vstv %s176_s2  ;;  %v30_v1 = vld [vmem:[#allocation3] sm:$0xff]  ;;  %v31_v4 = vld [vmem:[#allocation3 + $0x8] sm:$0xff]  ;;  %s114_s5 = smov [#allocation6]  }
  0x14   :  { %v33_v2 = vld [vmem:[%s175_s1] sm:$0xff]  ;;  %v34_v5 = vld [vmem:[%s175_s1 + $0x8] sm:$0xff]  ;;  %s47_s6 = sshll.u32 %s114_s5, 4  ;;  %s48_s6 = int_to_ptr.vmem [resolvable:$true] %s47_s6 }
  0x15   :  { %v36_v3 = vmul.f32 %v35_v0, %v33_v2  ;;  %v37_v6 = vmul.f32 %v35_v0, %v34_v5  ;;  %s85_s0 = scalar_lea.vmem %s48_s6, 256  ;;  %p90_p9 = scmp.lt.s32.totalorder %s48_s6, %s48_s6 }
  0x16   :  { %p86_p8 = scmp.ne.s32.totalorder %s48_s6, %s85_s0  ;;  %p91_p10 = scmp.lt.s32.totalorder %s85_s0, %s85_s0 }
  0x17   :  { %v38_v7 = vadd.f32 %v36_v3, %v30_v1  ;;  %v39_v8 = vadd.f32 %v37_v6, %v31_v4 }
  0x18   :  { %p92_p11 = por %p91_p10, %p90_p9 }
  0x19   :  { %40 = vst [vmem:[#allocation6] sm:$0xff] %v38_v7  ;;  %41 = vst [vmem:[#allocation6 + $0x8] sm:$0xff] %v39_v8 }
  0x1a   :  { %p93_p12 = pnand %p92_p11, %p86_p8 }
  0x1c   :  { %96 = shalt.err (!%p93_p12)
}
  0x1d   :  { %s97_s8 = scalar_lea.hbm %s177_s3, 256 }
  0x1e   :  { %p98_p13 = scmp.ne.s32.totalorder %s177_s3, %s97_s8  ;;  %p101_p0 = scmp.lt.u32.totalorder %s97_s8, %s177_s3 }
  0x20   :  { %p103_p1 = pnand %p101_p0, %p98_p13 }
  0x22   :  { %106 = shalt.err (!%p103_p1)
}
  0x23   :  { %53 = dma.vmem_to_hbm [thread:$0]  %s48_s6, 256, %s177_s3, [#allocation5], %s112_s22, %s112_s22, %s113_s23  }
  0x24   :  { %109 = dma.done.wait [#allocation5], 256  }
  0x25   :  { %110 = vsyncadd [#allocation5], 4294967040 }
  0x26   :  { %57 = vsyncpa [#allocation4], 1 }
  0x27   :  { %58 = vsyncpa [#allocation5], 1 }

</bundles_post_ra>
